<compile_context>
chip_gen: v7x
topology: tpu7x:2x2x1
jax: 0.10.0
libtpu: 0.0.40
codegen_flags: <defaults>
</compile_context>

<pallas_src>
import jax
import jax.numpy as jnp
from jax import lax
from jax.experimental import pallas as pl
from jax.experimental.pallas import tpu as pltpu


def _cdiv(a: int, b: int) -> int:
    return (a + b - 1) // b


def _round_up(x: int, m: int) -> int:
    return _cdiv(x, m) * m


def _tpu_info():
    try:
        return pltpu.get_tpu_info()
    except Exception:
        return None


def _vmem_budget_bytes() -> int:
    """Per-core VMEM capacity with ~20% headroom for Mosaic internal scratch."""
    phys = 64 * 1024 * 1024          # conservative fallback (v7x per-TC figure)
    info = _tpu_info()
    if info is not None:
        for attr in ("vmem_capacity_bytes", "vmem_bytes", "vmem_size_bytes"):
            v = getattr(info, attr, None)
            if v:
                phys = int(v)
                break
    return int(phys * 0.8)


def _num_tensorcores() -> int:
    """TensorCores per chip (2 on v7x, 1 on v5e/v6e); best-effort query."""
    info = _tpu_info()
    if info is not None:
        for attr in ("num_tensorcores", "tensorcore_count", "num_cores", "core_count"):
            v = getattr(info, attr, None)
            if v:
                return max(1, min(int(v), 2))
    return 1


# ---------------------------------------------------------------------------
# Path 1: fused kernel -- whole vocab per step.
# ---------------------------------------------------------------------------
def _fused_kernel(x_ref, w_ref, b_ref, o_ref):
    # x: (tm, D)  w: (D, V)  b: (1, V)  o: (tm, V)
    # Reuse one (tm, V) f32 value chain (logits -> shifted -> exp) to keep only
    # ~one full-size f32 temporary live at a time.
    logits = jnp.dot(x_ref[...], w_ref[...], preferred_element_type=jnp.float32)
    logits = logits + b_ref[...]
    logits = logits - jnp.max(logits, axis=-1, keepdims=True)
    p = jnp.exp(logits)
    # Exact normalization: rows sum to 1 (this feeds a probability distribution).
    o_ref[...] = (p / jnp.sum(p, axis=-1, keepdims=True)).astype(o_ref.dtype)


# ---------------------------------------------------------------------------
# Path 2, pass A: matmul once per (row tile, vocab tile), write unnormalized
# exp(logits - m_running) and the per-tile rescale factors.
# ---------------------------------------------------------------------------
def _exp_stats_kernel(x_ref, w_ref, b_ref, e_ref, scale_ref, m_sc, l_sc):
    j = pl.program_id(1)
    nv = pl.num_programs(1)

    @pl.when(j == 0)
    def _():
        m_sc[...] = jnp.full_like(m_sc, -jnp.inf)
        l_sc[...] = jnp.zeros_like(l_sc)
        scale_ref[...] = jnp.zeros_like(scale_ref)   # VMEM-resident, overwritten below

    logits = jnp.dot(x_ref[...], w_ref[...], preferred_element_type=jnp.float32)
    logits = logits + b_ref[...]

    m_prev = m_sc[...]
    m_new = jnp.maximum(m_prev, jnp.max(logits, axis=-1, keepdims=True))
    e = jnp.exp(logits - m_new)                       # <= 1, no overflow
    l_new = l_sc[...] * jnp.exp(m_prev - m_new) + jnp.sum(e, axis=-1, keepdims=True)
    m_sc[...] = m_new
    l_sc[...] = l_new
    e_ref[...] = e.astype(e_ref.dtype)                # unnormalized exp tile

    # Record the running max in effect for this vocab tile in column j.
    col = lax.broadcasted_iota(jnp.int32, scale_ref.shape, 1)
    m_hist = jnp.where(col == j, m_new, scale_ref[...])

    @pl.when(j < nv - 1)
    def _():
        scale_ref[...] = m_hist

    @pl.when(j == nv - 1)
    def _():
        # m_new / l_new are now the global per-row max and sum: convert the max
        # history in place into the final per-tile rescale factors.
        scale_ref[...] = jnp.exp(m_hist - m_new) / l_new


# ---------------------------------------------------------------------------
# Path 2, pass B: out = E_j * scale_j   (no weight stream, no matmul).
# ---------------------------------------------------------------------------
def _rescale_kernel(scale_ref, e_ref, o_ref):
    j = pl.program_id(1)
    col = lax.broadcasted_iota(jnp.int32, scale_ref.shape, 1)
    s_j = jnp.sum(jnp.where(col == j, scale_ref[...], 0.0), axis=1, keepdims=True)
    o_ref[...] = (e_ref[...].astype(jnp.float32) * s_j).astype(o_ref.dtype)


def projection_head(x, w_t, bias, *, tm=None, tv=None, use_vocab_tiling=None,
                    compute_dtype=jnp.bfloat16):
    """softmax(x @ w_t + bias, axis=-1)  ==  Softmax(Linear(x)).

    Args:
      x:    (..., model_dim) activations.
      w_t:  (model_dim, vocab) -- nn.Linear weight PRE-TRANSPOSED once at
            parameter-setup time (no per-call HBM transpose).
      bias: (vocab,)
      tm, tv: optional row / vocab tile overrides.
      use_vocab_tiling: None = auto (VMEM-budget based).
      compute_dtype: dtype the matmul operands are streamed / fed to the MXU in
            (bf16 halves the dominant weight HBM stream and uses the full-rate
            MXU path).  Accumulation and all softmax math stay in f32.  Pass
            jnp.float32 (or None) for exact f32 semantics.
    """
    orig_shape = x.shape
    D = orig_shape[-1]
    D_w, V = w_t.shape
    assert D == D_w and bias.shape == (V,)

    out_dtype = x.dtype
    x2 = x.reshape(-1, D)
    M = x2.shape[0]

    if compute_dtype is not None:
        x2 = x2.astype(compute_dtype)
        w_t = w_t.astype(compute_dtype)
    xsz = jnp.dtype(x2.dtype).itemsize
    wsz = jnp.dtype(w_t.dtype).itemsize
    osz = jnp.dtype(out_dtype).itemsize
    b2 = bias.astype(jnp.float32).reshape(1, V)       # bias / softmax math in f32

    # Unnormalized-exp intermediate: f32 unless the final output is 16-bit
    # (then its own precision is the limit anyway and storing it 16-bit halves
    # the pass-A write + pass-B read traffic).
    e_dtype = out_dtype if osz < 4 else jnp.float32
    esz = jnp.dtype(e_dtype).itemsize

    budget = _vmem_budget_bytes()
    ncores = _num_tensorcores()
    mib = 1024 * 1024

    # Sublane alignment for row tiles: 8 for 4-byte, 16 for 2-byte dtypes.
    row_align = max(8, 32 // max(1, min(xsz, osz, esz)))
    m_al = _round_up(M, row_align)

    def _pick_tm(pref):
        t = _round_up(min(int(pref), m_al), row_align)
        # Only force a split across row tiles when the chip has >1 TensorCore.
        if ncores > 1 and M >= 64 * ncores and _cdiv(m_al, t) < ncores:
            t = _round_up(_cdiv(m_al, ncores), row_align)
        return t

    def _fused_bytes(t):
        return (2 * D * V * wsz            # resident weight (counted double-buffered)
                + 2 * t * D * xsz          # x tiles (double-buffered)
                + 2 * V * 4                # bias
                + 2 * t * V * osz          # output tiles (double-buffered)
                + 2 * t * V * 4)           # f32 logits/exp temporaries

    if use_vocab_tiling is None:
        use_vocab_tiling = _fused_bytes(_pick_tm(256 if tm is None else tm)) > 0.75 * budget

    # ------------------------------ fused path ------------------------------
    if not use_vocab_tiling:
        tm_eff = _pick_tm(256 if tm is None else tm)
        while tm_eff > row_align and _fused_bytes(tm_eff) > 0.75 * budget:
            tm_eff = max(row_align, _round_up(tm_eff // 2, row_align))
        M_pad = _round_up(M, tm_eff)
        if M_pad != M:
            x2 = jnp.pad(x2, ((0, M_pad - M), (0, 0)))
        num_m = M_pad // tm_eff
        vmem = min(max(int(1.25 * _fused_bytes(tm_eff)), 32 * mib), budget)

        out = pl.pallas_call(
            _fused_kernel,
            out_shape=jax.ShapeDtypeStruct((M_pad, V), out_dtype),
            grid_spec=pltpu.PrefetchScalarGridSpec(
                num_scalar_prefetch=0,
                grid=(num_m,),
                in_specs=[
                    pl.BlockSpec((tm_eff, D), lambda i: (i, 0)),
                    pl.BlockSpec((D, V), lambda i: (0, 0)),     # grid-invariant
                    pl.BlockSpec((1, V), lambda i: (0, 0)),     # grid-invariant
                ],
                out_specs=pl.BlockSpec((tm_eff, V), lambda i: (i, 0)),
            ),
            compiler_params=pltpu.CompilerParams(
                dimension_semantics=("parallel",),
                vmem_limit_bytes=vmem),
        )(x2, w_t, b2)
        return out[:M].reshape(*orig_shape[:-1], V)

    # --------------------------- vocab-tiled path ---------------------------
    tm_eff = _pick_tm(512 if tm is None else tm)       # weight streamed once per row tile
    tv_eff = min(_round_up(int(tv) if tv is not None else 1024, 128),
                 _round_up(V, 128))

    def _tiled_bytes(t_m, t_v):
        n_v = _cdiv(_round_up(V, t_v), t_v)
        return (2 * t_m * D * xsz          # x (double-buffered, resident per row tile)
                + 2 * D * t_v * wsz        # weight tile (double-buffered)
                + 2 * t_v * 4              # bias tile
                + 2 * t_m * t_v * esz      # unnormalized-exp output
                + 2 * t_m * t_v * 4        # in-kernel f32 logits / exp temps
                + 4 * t_m * n_v * 4        # per-tile rescale output (generous)
                + 4 * t_m * 4)             # running max / sum scratch

    while tv_eff > 256 and _tiled_bytes(tm_eff, tv_eff) > 0.6 * budget:
        tv_eff = max(256, _round_up(tv_eff // 2, 128))
    while tm_eff > 64 and _tiled_bytes(tm_eff, tv_eff) > 0.6 * budget:
        tm_eff = max(64, _round_up(tm_eff // 2, row_align))

    M_pad = _round_up(M, tm_eff)
    if M_pad != M:
        x2 = jnp.pad(x2, ((0, M_pad - M), (0, 0)))
    num_m = M_pad // tm_eff

    V_pad = _round_up(V, tv_eff)
    if V_pad != V:
        # Padded vocab columns: zero weights + very negative bias so their exp()
        # is exactly 0 and they never pollute the softmax.
        w_t = jnp.pad(w_t, ((0, 0), (0, V_pad - V)))
        b2 = jnp.pad(b2, ((0, 0), (0, V_pad - V)), constant_values=-1e30)
    num_v = V_pad // tv_eff

    # Pass A: matmul + online stats + unnormalized exp (each output block
    # written exactly once; the (tm, num_v) scale block stays VMEM-resident).
    vmem_a = min(max(int(1.5 * _tiled_bytes(tm_eff, tv_eff)), 32 * mib), budget)
    exp_u, scale = pl.pallas_call(
        _exp_stats_kernel,
        out_shape=(jax.ShapeDtypeStruct((M_pad, V_pad), e_dtype),
                   jax.ShapeDtypeStruct((M_pad, num_v), jnp.float32)),
        grid_spec=pltpu.PrefetchScalarGridSpec(
            num_scalar_prefetch=0,
            grid=(num_m, num_v),
            in_specs=[
                pl.BlockSpec((tm_eff, D), lambda i, j: (i, 0)),
                pl.BlockSpec((D, tv_eff), lambda i, j: (0, j)),
                pl.BlockSpec((1, tv_eff), lambda i, j: (0, j)),
            ],
            out_specs=[
                pl.BlockSpec((tm_eff, tv_eff), lambda i, j: (i, j)),
                pl.BlockSpec((tm_eff, num_v), lambda i, j: (i, 0)),   # resident
            ],
            scratch_shapes=[pltpu.VMEM((tm_eff, 1), jnp.float32),     # running max
                            pltpu.VMEM((tm_eff, 1), jnp.float32)],    # running sum
        ),
        compiler_params=pltpu.CompilerParams(
            dimension_semantics=("parallel", "arbitrary"),
            vmem_limit_bytes=vmem_a),
    )(x2, w_t, b2)

    # Pass B: rescale only (no weight, no matmul).  Under jit, passing
    # input_output_aliases={1: 0} here would also reuse exp_u's HBM buffer.
    rescale_bytes = (2 * tm_eff * num_v * 4 + 2 * tm_eff * tv_eff * esz
                     + 2 * tm_eff * tv_eff * osz + 2 * tm_eff * tv_eff * 4)
    vmem_b = min(max(int(1.5 * rescale_bytes), 32 * mib), budget)
    out = pl.pallas_call(
        _rescale_kernel,
        out_shape=jax.ShapeDtypeStruct((M_pad, V_pad), out_dtype),
        grid_spec=pltpu.PrefetchScalarGridSpec(
            num_scalar_prefetch=0,
            grid=(num_m, num_v),
            in_specs=[
                pl.BlockSpec((tm_eff, num_v), lambda i, j: (i, 0)),
                pl.BlockSpec((tm_eff, tv_eff), lambda i, j: (i, j)),
            ],
            out_specs=pl.BlockSpec((tm_eff, tv_eff), lambda i, j: (i, j)),
        ),
        compiler_params=pltpu.CompilerParams(
            dimension_semantics=("parallel", "arbitrary"),
            vmem_limit_bytes=vmem_b),
    )(scale, exp_u)

    out = out[:M, :V]
    return out.reshape(*orig_shape[:-1], V)


if __name__ == "__main__":
    # (batch, seq, model_dim) -> (batch, seq, vocab)
    batch, seq, model_dim, vocab_size = 2, 8, 32, 256

    key = jax.random.PRNGKey(0)
    kx, kw, kb = jax.random.split(key, 3)

    x = jax.random.normal(kx, (batch, seq, model_dim), dtype=jnp.float32)
    # Deterministic nn.Linear-style init: U(-1/sqrt(model_dim), 1/sqrt(model_dim))
    bound = 1.0 / (model_dim ** 0.5)
    weight = jax.random.uniform(
        kw, (vocab_size, model_dim), minval=-bound, maxval=bound, dtype=jnp.float32)
    bias = jax.random.uniform(
        kb, (vocab_size,), minval=-bound, maxval=bound, dtype=jnp.float32)

    # Pre-transpose the nn.Linear weight ONCE at parameter-setup time.
    w_t = jnp.asarray(weight.T)   # (model_dim, vocab)

    ref = jax.nn.softmax(x @ weight.T + bias, axis=-1)

    # Path 1: fused (auto), default bf16 matmul operand streaming.
    out_fused = jax.block_until_ready(projection_head(x, w_t, bias))
    assert out_fused.shape == (batch, seq, vocab_size)
    assert jnp.allclose(out_fused, ref, atol=2e-3, rtol=2e-3)
    assert jnp.allclose(jnp.sum(out_fused, axis=-1), 1.0, atol=2e-3)

    # Exact f32 path (strict nn.Linear f32 semantics).
    out_f32 = jax.block_until_ready(
        projection_head(x, w_t, bias, compute_dtype=jnp.float32))
    assert jnp.allclose(out_f32, ref, atol=2e-3, rtol=2e-3)

    # Path 2: vocab-tiled (forced, small tiles so the online reduction over
    # multiple vocab tiles and the matmul-free rescale pass are exercised).
    out_tiled = jax.block_until_ready(
        projection_head(x, w_t, bias, tm=8, tv=128, use_vocab_tiling=True))
    assert out_tiled.shape == (batch, seq, vocab_size)
    assert jnp.allclose(out_tiled, ref, atol=2e-3, rtol=2e-3)
    assert jnp.allclose(jnp.sum(out_tiled, axis=-1), 1.0, atol=2e-3)

    # Tiled path with row padding (M=10) and vocab padding (V=200 -> 256).
    x_ragged = x[:, :5]
    w_small, b_small = w_t[:, :200], bias[:200]
    ref_ragged = jax.nn.softmax(x_ragged @ w_small + b_small, axis=-1)
    out_ragged = jax.block_until_ready(
        projection_head(x_ragged, w_small, b_small, tm=8, tv=128,
                        use_vocab_tiling=True))
    assert out_ragged.shape == (batch, 5, 200)
    assert jnp.allclose(out_ragged, ref_ragged, atol=2e-3, rtol=2e-3)

    print("KERNEL_OK")
</pallas_src>

<mosaic_0001>
module attributes {stable_mosaic.version = 11 : i64} {
  func.func @_fused_kernel(%arg0: i32, %arg1: memref<16x32xbf16, #tpu.memory_space<vmem>>, %arg2: memref<32x256xbf16, #tpu.memory_space<vmem>>, %arg3: memref<1x256xf32, #tpu.memory_space<vmem>>, %arg4: memref<16x256xf32, #tpu.memory_space<vmem>>) attributes {dimension_semantics = [#tpu.dimension_semantics<parallel>], iteration_bounds = array<i64: 1>, scalar_prefetch = 0 : i64, scratch_operands = 0 : i64, tpu.core_type = #tpu.core_type<tc>, window_params = [{transform_indices = @transform_0, window_bounds = array<i64: 16, 32>}, {pipeline_mode = #tpu.pipeline_mode<synchronous>, transform_indices = @transform_1, window_bounds = array<i64: 32, 256>}, {pipeline_mode = #tpu.pipeline_mode<synchronous>, transform_indices = @transform_2, window_bounds = array<i64: 1, 256>}, {transform_indices = @transform_3, window_bounds = array<i64: 16, 256>}]} {
    %c0 = arith.constant 0 : index
    %c0_0 = arith.constant 0 : index
    %0 = vector.load %arg1[%c0, %c0_0] : memref<16x32xbf16, #tpu.memory_space<vmem>>, vector<16x32xbf16>
    %c0_1 = arith.constant 0 : index
    %c0_2 = arith.constant 0 : index
    %1 = vector.load %arg2[%c0_1, %c0_2] : memref<32x256xbf16, #tpu.memory_space<vmem>>, vector<32x256xbf16>
    %cst = arith.constant dense<0.000000e+00> : vector<16x256xf32>
    %2 = tpu.matmul %0, %1, %cst {dimension_numbers = #tpu.dot_dimension_numbers<[1], [0], [0], [1], [0, 0, 1, 1], [], []>} : vector<16x32xbf16>, vector<32x256xbf16>, vector<16x256xf32> -> vector<16x256xf32>
    %c0_3 = arith.constant 0 : index
    %c0_4 = arith.constant 0 : index
    %3 = vector.load %arg3[%c0_3, %c0_4] : memref<1x256xf32, #tpu.memory_space<vmem>>, vector<1x256xf32>
    %4 = vector.broadcast %3 : vector<1x256xf32> to vector<16x256xf32>
    %5 = arith.addf %2, %4 : vector<16x256xf32>
    %cst_5 = arith.constant dense<0xFF800000> : vector<16xf32>
    %6 = vector.multi_reduction <maximumf>, %5, %cst_5 [1] : vector<16x256xf32> to vector<16xf32>
    %7 = vector.shape_cast %6 : vector<16xf32> to vector<16x1xf32>
    %8 = vector.broadcast %7 : vector<16x1xf32> to vector<16x256xf32>
    %9 = arith.subf %5, %8 : vector<16x256xf32>
    %10 = math.exp %9 : vector<16x256xf32>
    %cst_6 = arith.constant dense<0.000000e+00> : vector<16xf32>
    %11 = vector.multi_reduction <add>, %10, %cst_6 [1] : vector<16x256xf32> to vector<16xf32>
    %12 = vector.shape_cast %11 : vector<16xf32> to vector<16x1xf32>
    %13 = vector.broadcast %12 : vector<16x1xf32> to vector<16x256xf32>
    %14 = arith.divf %10, %13 : vector<16x256xf32>
    %c0_7 = arith.constant 0 : index
    %c0_8 = arith.constant 0 : index
    %15 = vector.load %arg4[%c0_7, %c0_8] : memref<16x256xf32, #tpu.memory_space<vmem>>, vector<16x256xf32>
    tpu.vector_store %arg4[%c0_7, %c0_8], %14 {strides = array<i32>} : memref<16x256xf32, #tpu.memory_space<vmem>>, vector<16x256xf32>,
    return
  }
  func.func @transform_0(%arg0: i32) -> (i32, i32) {
    %c0_i32 = arith.constant 0 : i32
    %c0_i32_0 = arith.constant 0 : i32
    return %arg0, %c0_i32 : i32, i32
  }
  func.func @transform_1(%arg0: i32) -> (i32, i32) {
    %c0_i32 = arith.constant 0 : i32
    %c0_i32_0 = arith.constant 0 : i32
    %c0_i32_1 = arith.constant 0 : i32
    return %c0_i32, %c0_i32_0 : i32, i32
  }
  func.func @transform_2(%arg0: i32) -> (i32, i32) {
    %c0_i32 = arith.constant 0 : i32
    %c0_i32_0 = arith.constant 0 : i32
    %c0_i32_1 = arith.constant 0 : i32
    return %c0_i32, %c0_i32_0 : i32, i32
  }
  func.func @transform_3(%arg0: i32) -> (i32, i32) {
    %c0_i32 = arith.constant 0 : i32
    %c0_i32_0 = arith.constant 0 : i32
    return %arg0, %c0_i32 : i32, i32
  }
}

</mosaic_0001>

<bundles_post_ra>
// kernel: tpu_custom_call.1
= control target key start
LH: loop header
LB: loop body
LE: loop exit
PB: predicated region body
PF: predicated region fallthrough
CT: control target
= control target key end

     0   :  { %8 = vsyncpa [#allocation3], 0  ;;  %s362_s0 = inlined_call_operand.hbm [shape: bf16[16,32], index: 0, kind: input, shape index: {}]   ;;  %s363_s1 = inlined_call_operand.hbm [shape: bf16[32,256], index: 1, kind: input, shape index: {}]   ;;  %s364_s2 = inlined_call_operand.vmem [shape: f32[1,256], index: 2, kind: input, shape index: {}]   ;;  %s365_s3 = inlined_call_operand.hbm [shape: f32[16,256], index: 3, kind: output, shape index: {}]  }
   0x1   :  { %9 = vsyncpa [#allocation6], 0 }
   0x2   :  { %10 = vsyncpa [#allocation4], 0  ;;  %s293_s12 = smov [#allocation2]   ;;  %s221_s16 = scalar_lea.hbm %s362_s0, 128 }
   0x3   :  { %s16_s13 = sshll.u32 %s293_s12, 4  ;;  %p222_p0 = scmp.ne.s32.totalorder %s362_s0, %s221_s16  ;;  %s17_s13 = int_to_ptr.vmem [resolvable:$true] %s16_s13 }
   0x4   :  { %p225_p1 = scmp.lt.u32.totalorder %s221_s16, %s362_s0 }
   0x6   :  { %p227_p2 = pnand %p225_p1, %p222_p0 }
   0x8   :  { %230 = shalt.err (!%p227_p2)
}
   0x9   :  { %s231_s21 = scalar_lea.vmem %s17_s13, 128  ;;  %p236_p4 = scmp.lt.s32.totalorder %s17_s13, %s17_s13 }
   0xa   :  { %p232_p3 = scmp.ne.s32.totalorder %s17_s13, %s231_s21  ;;  %p237_p5 = scmp.lt.s32.totalorder %s231_s21, %s231_s21 }
   0xc   :  { %p238_p6 = por %p237_p5, %p236_p4 }
   0xe   :  { %p239_p7 = pnand %p238_p6, %p232_p3 }
  0x10   :  { %242 = shalt.err (!%p239_p7)
}
  0x11   :  { %s294_s22 = smov 64   ;;  %s295_s23 = smov 4  }
  0x12   :  { %22 = dma.hbm_to_vmem [thread:$0]  %s362_s0, 128, %s17_s13, [#allocation3], %s294_s22, %s294_s22, %s295_s23  }
  0x13   :  { %s296_s26 = smov [#allocation5]   ;;  %s243_s30 = scalar_lea.hbm %s363_s1, 512 }
  0x14   :  { %s28_s27 = sshll.u32 %s296_s26, 4  ;;  %p244_p8 = scmp.ne.s32.totalorder %s363_s1, %s243_s30  ;;  %s29_s27 = int_to_ptr.vmem [resolvable:$true] %s28_s27 }
  0x15   :  { %p247_p9 = scmp.lt.u32.totalorder %s243_s30, %s363_s1 }
  0x17   :  { %p249_p10 = pnand %p247_p9, %p244_p8 }
  0x19   :  { %252 = shalt.err (!%p249_p10)
}
  0x1a   :  { %s253_s8 = scalar_lea.vmem %s29_s27, 512  ;;  %p258_p12 = scmp.lt.s32.totalorder %s29_s27, %s29_s27 }
  0x1b   :  { %p254_p11 = scmp.ne.s32.totalorder %s29_s27, %s253_s8  ;;  %p259_p13 = scmp.lt.s32.totalorder %s253_s8, %s253_s8 }
  0x1d   :  { %p260_p0 = por %p259_p13, %p258_p12 }
  0x1f   :  { %p261_p1 = pnand %p260_p0, %p254_p11 }
  0x21   :  { %264 = shalt.err (!%p261_p1)
}
  0x22   :  { %s297_s0 = smov 128   ;;  %s298_s9 = smov 8  }
  0x23   :  { %34 = dma.hbm_to_vmem [thread:$0]  %s363_s1, 512, %s29_s27, [#allocation6], %s297_s0, %s297_s0, %s298_s9  }
  0x24   :  { %287 = dma.done.wait [#allocation3], 128  }
  0x25   :  { %288 = vsyncadd [#allocation3], 4294967168 }
  0x26   :  { %289 = dma.done.wait [#allocation6], 512  }
  0x27   :  { %290 = vsyncadd [#allocation6], 4294966784  ;;  %v299_v0 = vmov 0   ;;  %v202_v1 = vld [vmem:[#allocation5 + $0x4] ss:$8 sps:$4 sm:$0xff]   ;;  %v208_v5 = vld [vmem:[#allocation2] sm:$0xff]   ;;  %v52_v6 = vlaneseq }
  0x28   :  { %123 = vmatprep.mubr.bf16.mxu0 %v299_v0  ;;  %v204_v2 = vld [vmem:[#allocation5] ss:$8 sps:$4 sm:$0xff]   ;;  %91 = vmatprep.subr.bf16.mxu0 %v202_v1  ;;  %v205_v3 = vld [vmem:[#allocation5 + $0x14] ss:$8 sps:$4 sm:$0xff]   ;;  %v207_v4 = vld [vmem:[#allocation5 + $0x10] ss:$8 sps:$4 sm:$0xff]  }
  0x29   :  { %92 = vmatpush1.bf16.msra.mxu0 %v204_v2  ;;  %vm87_vm0 = vcmask 261120   ;;  %v53_v7 = vshrl.u32 %v52_v6, 7  ;;  %v50_v9 = vld [vmem:[%s364_s2] sm:$0x3]  ;;  %s300_s2 = smov [#allocation7]  }
  0x2a   :  { %93 = vmatprep.subr.bf16.mxu0 %v205_v3  ;;  %s173_s13 = sshll.u32 %s300_s2, 4  ;;  %s174_s13 = int_to_ptr.vmem [resolvable:$true] %s173_s13 }
  0x2b   :  { %v54_v8 = vsub.s32 0, %v53_v7  ;;  %v58_v10 = vsub.s32 1, %v53_v7  ;;  %s265_s14 = scalar_lea.vmem %s174_s13, 512  ;;  %p270_p3 = scmp.lt.s32.totalorder %s174_s13, %s174_s13 }
  0x2c   :  { %p266_p2 = scmp.ne.s32.totalorder %s174_s13, %s265_s14  ;;  %p271_p4 = scmp.lt.s32.totalorder %s265_s14, %s265_s14 }
  0x2d   :  { %94 = vmatpush1.bf16.msra.mxu0 %v207_v4  ;;  %v55_v11 = vrot.slane %v50_v9, %v54_v8  ;;  %v59_v12 = vrot.slane %v50_v9, %v58_v10 }
  0x2e   :  { %p272_p5 = por %p271_p4, %p270_p3 }
  0x30   :  { %191 = vmatmul.mubr.msk.bf16.vlgmr.msra.gmra.mrb[0].mxu0 %vm87_vm0, %v208_v5  ;;  %p273_p6 = pnand %p272_p5, %p266_p2 }
 0x103   :  { %v125_v13 = vpop.f32.mrb[0].mxu0 }
 0x104   :  { %v126_v14 = vadd.f32 %v125_v13, %v55_v11  ;;  %v127_v15 = vpop.f32.mrb[1].mxu0 }
 0x105   :  { %v128_v16 = vadd.f32 %v127_v15, %v59_v12  ;;  %v129_v17 = vpop.f32.mrb[2].mxu0 }
 0x106   :  { %v131_v18 = vpop.f32.mrb[3].mxu0  ;;  %v130_v19 = vadd.f32 %v129_v17, %v55_v11 }
 0x107   :  { %v132_v20 = vadd.f32 %v131_v18, %v59_v12  ;;  %v134_v21 = vmax.f32 %v126_v14, %v128_v16 }
 0x109   :  { %135 = vmax.xlane.f32.xlu0 %v134_v21  ;;  %v137_v22 = vmax.f32 %v130_v19, %v132_v20 }
 0x10d   :  { %138 = vmax.xlane.f32.xlu0 %v137_v22 }
 0x196   :  { %v136_v23 = vpop.xlane.xlu0 %135 }
 0x197   :  { %v140_v24 = vsub.f32 %v126_v14, %v136_v23  ;;  %v141_v25 = vsub.f32 %v128_v16, %v136_v23 }
 0x199   :  { %v144_v26 = vmul.f32 1.442695, %v140_v24  ;;  %v146_v27 = vmul.f32 1.442695, %v141_v25 }
 0x19a   :  { %v139_v28 = vpop.xlane.xlu0 %138 }
 0x19b   :  { %209 = vpow2.f32 %v144_v26  ;;  %v142_v29 = vsub.f32 %v130_v19, %v139_v28  ;;  %v143_v30 = vsub.f32 %v132_v20, %v139_v28 }
 0x19c   :  { %211 = vpow2.f32 %v146_v27 }
 0x19d   :  { %v148_v31 = vmul.f32 1.442695, %v142_v29  ;;  %v150_v32 = vmul.f32 1.442695, %v143_v30 }
 0x19f   :  { %213 = vpow2.f32 %v148_v31 }
 0x1a0   :  { %215 = vpow2.f32 %v150_v32 }
 0x1a5   :  { %v210_v33 = vpop.eup %209 }
 0x1a6   :  { %v212_v34 = vpop.eup %211 }
 0x1a7   :  { %v152_v35 = vadd.f32 %v212_v34, %v210_v33 }
 0x1a9   :  { %v214_v36 = vpop.eup %213  ;;  %153 = vadd.xlane.f32.xlu1 %v152_v35 }
 0x1aa   :  { %v216_v37 = vpop.eup %215 }
 0x1ab   :  { %v155_v38 = vadd.f32 %v216_v37, %v214_v36 }
 0x1ad   :  { %156 = vadd.xlane.f32.xlu1 %v155_v38 }
 0x236   :  { %v154_v39 = vpop.xlane.xlu1 %153 }
 0x237   :  { %217 = vrcp.f32 %v154_v39 }
 0x23a   :  { %v157_v40 = vpop.xlane.xlu1 %156 }
 0x23b   :  { %219 = vrcp.f32 %v157_v40 }
 0x241   :  { %v218_v41 = vpop.eup %217 }
 0x242   :  { %v159_v42 = vmul.f32 %v218_v41, %v210_v33  ;;  %v160_v43 = vmul.f32 %v218_v41, %v212_v34 }
 0x244   :  { %164 = vst [vmem:[#allocation7] sm:$0xff] %v159_v42  ;;  %165 = vst [vmem:[#allocation7 + $0x8] sm:$0xff] %v160_v43 }
 0x245   :  { %v220_v44 = vpop.eup %219 }
 0x246   :  { %v162_v45 = vmul.f32 %v220_v44, %v214_v36  ;;  %v163_v46 = vmul.f32 %v220_v44, %v216_v37 }
 0x248   :  { %166 = vst [vmem:[#allocation7 + $0x10] sm:$0xff] %v162_v45  ;;  %167 = vst [vmem:[#allocation7 + $0x18] sm:$0xff] %v163_v46 }
 0x249   :  { %276 = shalt.err (!%p273_p6)
}
 0x24a   :  { %s277_s17 = scalar_lea.hbm %s365_s3, 512 }
 0x24b   :  { %p278_p7 = scmp.ne.s32.totalorder %s365_s3, %s277_s17  ;;  %p281_p8 = scmp.lt.u32.totalorder %s277_s17, %s365_s3 }
 0x24d   :  { %p283_p9 = pnand %p281_p8, %p278_p7 }
 0x24f   :  { %286 = shalt.err (!%p283_p9)
}
 0x250   :  { %s301_s22 = smov 256   ;;  %s302_s23 = smov 16  }
 0x251   :  { %179 = dma.vmem_to_hbm [thread:$0]  %s174_s13, 512, %s365_s3, [#allocation4], %s301_s22, %s301_s22, %s302_s23  }
 0x252   :  { %291 = dma.done.wait [#allocation4], 512  }
 0x253   :  { %292 = vsyncadd [#allocation4], 4294966784 }
 0x254   :  { %183 = vsyncpa [#allocation3], 1 }
 0x255   :  { %184 = vsyncpa [#allocation6], 1 }
 0x256   :  { %185 = vsyncpa [#allocation4], 1 }

</bundles_post_ra>
